<compile_context>
chip_gen: v7x
topology: tpu7x:2x2x1
jax: 0.10.0
libtpu: 0.0.40
codegen_flags: <defaults>
</compile_context>

<pallas_src>
import functools

import jax
import jax.numpy as jnp
from jax import lax
from jax.experimental import pallas as pl
from jax.experimental.pallas import tpu as pltpu


def _coattention_kernel(keys_ref, q_ref, a_ref, out_ref, *, strip_r):
    """out[0, r, c] = sum_h a[h] * tanh(keys[0, r, h] + queries_t[0, h, c])."""
    # keys_ref : (1, tile_r, H)      VMEM   (bias already folded in)
    # q_ref    : (1, H, tile_a)      VMEM   (queries pre-transposed: N_a on lanes)
    # a_ref    : (H,)                SMEM   (cheap scalar reads)
    # out_ref  : (1, tile_r, tile_a) VMEM
    tile_r = out_ref.shape[1]
    tile_a = out_ref.shape[2]
    h_dim = keys_ref.shape[2]
    num_strips = tile_r // strip_r

    # Row-strip loop: a visible scf.for bounds live ranges across strips.  The
    # per-strip accumulator (strip_r x tile_a f32, <= 16 vregs) stays register
    # resident across the whole h loop and is stored exactly once.
    @pl.loop(0, num_strips)
    def _(s):
        row0 = pl.multiple_of(s * strip_r, strip_r)
        k_strip = keys_ref[0, pl.ds(row0, strip_r), :]          # (strip_r, H)
        acc = jnp.zeros((strip_r, tile_a), jnp.float32)
        # Static h loop confined to the strip (h_dim = n_features // 2, small):
        #   tanh on the EUP (binding unit), scale + accumulate on the VPU,
        #   queries row is a cheap static VMEM load, keys-column lane
        #   broadcast rides the otherwise idle broadcast/XLU path.
        for h in range(h_dim):
            e_h = k_strip[:, h:h + 1] + q_ref[0, h:h + 1, :]    # (strip_r, tile_a)
            acc = acc + a_ref[h] * jnp.tanh(e_h)
        out_ref[0, pl.ds(row0, strip_r), :] = acc.astype(out_ref.dtype)


def _round_up(x, m):
    return ((x + m - 1) // m) * m


def _pick_tile(padded, target, quantum):
    """Largest multiple of `quantum`, <= target, dividing `padded` (>= quantum)."""
    t = min(target, padded)
    t = (t // quantum) * quantum
    while t > quantum and padded % t != 0:
        t -= quantum
    return max(t, quantum)


@jax.jit
def coattention_pallas(receiver, attendant, w_k, w_q, bias, a):
    B, N_r, F = receiver.shape
    _, N_a, _ = attendant.shape
    H = w_k.shape[1]
    f32 = jnp.float32
    hi = lax.Precision.HIGHEST

    # Hoisted projections (done ONCE in XLA, not per output tile in the grid).
    keys = jnp.einsum('brf,fh->brh', receiver.astype(f32), w_k.astype(f32),
                      precision=hi) + bias.astype(f32)            # (B, N_r, H)
    queries_t = jnp.einsum('baf,fh->bha', attendant.astype(f32), w_q.astype(f32),
                           precision=hi)                          # (B, H, N_a)

    # Pad to sublane/lane friendly sizes; padded region is sliced off below.
    p_nr = _round_up(N_r, 8)
    p_na = _round_up(N_a, 128)
    if p_nr != N_r:
        keys = jnp.pad(keys, ((0, 0), (0, p_nr - N_r), (0, 0)))
    if p_na != N_a:
        queries_t = jnp.pad(queries_t, ((0, 0), (0, 0), (0, p_na - N_a)))

    # Output tile caps: <= 256 x 512 f32 (512 KiB) => double-buffered blocks
    # stay a few MiB, comfortable inside v7x's 64 MiB physical VMEM.
    tile_r = _pick_tile(p_nr, 256, 8)
    tile_a = _pick_tile(p_na, 512, 128)
    if tile_r <= 32:
        strip_r = tile_r
    elif tile_r % 32 == 0:
        strip_r = 32
    elif tile_r % 16 == 0:
        strip_r = 16
    else:
        strip_r = 8

    grid = (B, p_nr // tile_r, p_na // tile_a)

    kernel = functools.partial(_coattention_kernel, strip_r=strip_r)

    grid_spec = pltpu.PrefetchScalarGridSpec(
        num_scalar_prefetch=0,
        grid=grid,
        in_specs=[
            pl.BlockSpec((1, tile_r, H), lambda b, i, j: (b, i, 0)),   # keys
            pl.BlockSpec((1, H, tile_a), lambda b, i, j: (b, 0, j)),   # queries^T
            pl.BlockSpec(memory_space=pltpu.MemorySpace.SMEM),         # a (H,)
        ],
        out_specs=pl.BlockSpec((1, tile_r, tile_a), lambda b, i, j: (b, i, j)),
    )

    out = pl.pallas_call(
        kernel,
        out_shape=jax.ShapeDtypeStruct((B, p_nr, p_na), f32),
        grid_spec=grid_spec,
        compiler_params=pltpu.CompilerParams(
            dimension_semantics=("parallel", "parallel", "parallel"),
            vmem_limit_bytes=32 * 1024 * 1024,
        ),
    )(keys, queries_t, a.reshape(H).astype(f32))

    return out[:, :N_r, :N_a]


def coattention_ref(receiver, attendant, w_k, w_q, bias, a):
    hi = lax.Precision.HIGHEST
    keys = jnp.einsum('brf,fh->brh', receiver, w_k, precision=hi)
    queries = jnp.einsum('baf,fh->bah', attendant, w_q, precision=hi)
    e = queries[:, None, :, :] + keys[:, :, None, :] + bias
    return jnp.einsum('brah,h->bra', jnp.tanh(e), a, precision=hi)


def _xavier_uniform(key, shape, fan_in, fan_out, dtype=jnp.float32):
    bound = (6.0 / (fan_in + fan_out)) ** 0.5
    return jax.random.uniform(key, shape, dtype, minval=-bound, maxval=bound)


def _run_case(key, B, N_r, N_a, F):
    H = F // 2
    k_wq, k_wk, k_bias, k_a, k_recv, k_attd = jax.random.split(key, 6)

    # Match PyTorch xavier_uniform_ fan conventions:
    #   w_q, w_k: (F, H)           -> fan_in = H, fan_out = F
    #   bias.view(H, 1), a.view(H, 1) -> fan_in = 1, fan_out = H
    w_q = _xavier_uniform(k_wq, (F, H), fan_in=H, fan_out=F)
    w_k = _xavier_uniform(k_wk, (F, H), fan_in=H, fan_out=F)
    bias = _xavier_uniform(k_bias, (H,), fan_in=1, fan_out=H)
    a = _xavier_uniform(k_a, (H,), fan_in=1, fan_out=H)

    receiver = jax.random.normal(k_recv, (B, N_r, F), jnp.float32)
    attendant = jax.random.normal(k_attd, (B, N_a, F), jnp.float32)

    out = coattention_pallas(receiver, attendant, w_k, w_q, bias, a)
    out = jax.block_until_ready(out)

    ref = coattention_ref(receiver, attendant, w_k, w_q, bias, a)
    assert out.shape == (B, N_r, N_a), out.shape
    assert jnp.allclose(out, ref, atol=2e-4, rtol=2e-4), float(
        jnp.max(jnp.abs(out - ref)))


if __name__ == "__main__":
    key = jax.random.PRNGKey(0)
    k0, k1, k2 = jax.random.split(key, 3)
    # Small shape matching the module's expected sizes (N_a padded 8 -> 128).
    _run_case(k0, B=2, N_r=8, N_a=8, F=32)
    # Exercises the multi-strip path (tile_r=48 -> 3 strips) and lane padding.
    _run_case(k1, B=2, N_r=48, N_a=200, F=64)
    # Exercises padding (1100 -> 1152) and a multi-tile lane grid (3 j-tiles).
    _run_case(k2, B=2, N_r=24, N_a=1100, F=32)
    print("KERNEL_OK")
</pallas_src>

<mosaic_0001>
module attributes {stable_mosaic.version = 11 : i64} {
  func.func @_coattention_kernel(%arg0: i32, %arg1: i32, %arg2: i32, %arg3: memref<1x8x16xf32, #tpu.memory_space<vmem>>, %arg4: memref<1x16x128xf32, #tpu.memory_space<vmem>>, %arg5: memref<16xf32, #tpu.memory_space<smem>>, %arg6: memref<1x8x128xf32, #tpu.memory_space<vmem>>) attributes {dimension_semantics = [#tpu.dimension_semantics<parallel>, #tpu.dimension_semantics<parallel>, #tpu.dimension_semantics<parallel>], iteration_bounds = array<i64: 2, 1, 1>, scalar_prefetch = 0 : i64, scratch_operands = 0 : i64, tpu.core_type = #tpu.core_type<tc>, window_params = [{transform_indices = @transform_0, window_bounds = array<i64: 1, 8, 16>}, {transform_indices = @transform_1, window_bounds = array<i64: 1, 16, 128>}, {transform_indices = @transform_2, window_bounds = array<i64: 16>}, {transform_indices = @transform_3, window_bounds = array<i64: 1, 8, 128>}]} {
    %c0_i32 = arith.constant 0 : i32
    %c1_i32 = arith.constant 1 : i32
    %0 = arith.muli %c0_i32, %c1_i32 : i32
    %c0_i32_0 = arith.constant 0 : i32
    %1 = arith.addi %c0_i32_0, %0 : i32
    %c8_i32 = arith.constant 8 : i32
    %2 = arith.muli %1, %c8_i32 : i32
    %3 = tpu.assume_multiple %2, 8 : i32
    %c0 = arith.constant 0 : index
    %4 = arith.index_cast %3 : i32 to index
    %c0_1 = arith.constant 0 : index
    %5 = vector.load %arg3[%c0, %4, %c0_1] : memref<1x8x16xf32, #tpu.memory_space<vmem>>, vector<1x8x16xf32>
    %6 = vector.shape_cast %5 : vector<1x8x16xf32> to vector<8x16xf32>
    %cst = arith.constant 0.000000e+00 : f32
    %7 = vector.broadcast %cst : f32 to vector<8x128xf32>
    %8 = vector.extract_strided_slice %6 {offsets = [0, 0], sizes = [8, 1], strides = [1, 1]} : vector<8x16xf32> to vector<8x1xf32>
    %c0_2 = arith.constant 0 : index
    %c0_3 = arith.constant 0 : index
    %c0_4 = arith.constant 0 : index
    %9 = vector.load %arg4[%c0_2, %c0_3, %c0_4] : memref<1x16x128xf32, #tpu.memory_space<vmem>>, vector<1x1x128xf32>
    %10 = vector.shape_cast %9 : vector<1x1x128xf32> to vector<1x128xf32>
    %11 = vector.broadcast %8 : vector<8x1xf32> to vector<8x128xf32>
    %12 = vector.broadcast %10 : vector<1x128xf32> to vector<8x128xf32>
    %13 = arith.addf %11, %12 : vector<8x128xf32>
    %c0_5 = arith.constant 0 : index
    %14 = memref.load %arg5[%c0_5] : memref<16xf32, #tpu.memory_space<smem>>
    %15 = math.tanh %13 : vector<8x128xf32>
    %16 = vector.broadcast %14 : f32 to vector<8x128xf32>
    %17 = arith.mulf %16, %15 : vector<8x128xf32>
    %18 = arith.addf %7, %17 : vector<8x128xf32>
    %19 = vector.extract_strided_slice %6 {offsets = [0, 1], sizes = [8, 1], strides = [1, 1]} : vector<8x16xf32> to vector<8x1xf32>
    %c0_6 = arith.constant 0 : index
    %c1 = arith.constant 1 : index
    %c0_7 = arith.constant 0 : index
    %20 = vector.load %arg4[%c0_6, %c1, %c0_7] : memref<1x16x128xf32, #tpu.memory_space<vmem>>, vector<1x1x128xf32>
    %21 = vector.shape_cast %20 : vector<1x1x128xf32> to vector<1x128xf32>
    %22 = vector.broadcast %19 : vector<8x1xf32> to vector<8x128xf32>
    %23 = vector.broadcast %21 : vector<1x128xf32> to vector<8x128xf32>
    %24 = arith.addf %22, %23 : vector<8x128xf32>
    %c1_8 = arith.constant 1 : index
    %25 = memref.load %arg5[%c1_8] : memref<16xf32, #tpu.memory_space<smem>>
    %26 = math.tanh %24 : vector<8x128xf32>
    %27 = vector.broadcast %25 : f32 to vector<8x128xf32>
    %28 = arith.mulf %27, %26 : vector<8x128xf32>
    %29 = arith.addf %18, %28 : vector<8x128xf32>
    %30 = vector.extract_strided_slice %6 {offsets = [0, 2], sizes = [8, 1], strides = [1, 1]} : vector<8x16xf32> to vector<8x1xf32>
    %c0_9 = arith.constant 0 : index
    %c2 = arith.constant 2 : index
    %c0_10 = arith.constant 0 : index
    %31 = vector.load %arg4[%c0_9, %c2, %c0_10] : memref<1x16x128xf32, #tpu.memory_space<vmem>>, vector<1x1x128xf32>
    %32 = vector.shape_cast %31 : vector<1x1x128xf32> to vector<1x128xf32>
    %33 = vector.broadcast %30 : vector<8x1xf32> to vector<8x128xf32>
    %34 = vector.broadcast %32 : vector<1x128xf32> to vector<8x128xf32>
    %35 = arith.addf %33, %34 : vector<8x128xf32>
    %c2_11 = arith.constant 2 : index
    %36 = memref.load %arg5[%c2_11] : memref<16xf32, #tpu.memory_space<smem>>
    %37 = math.tanh %35 : vector<8x128xf32>
    %38 = vector.broadcast %36 : f32 to vector<8x128xf32>
    %39 = arith.mulf %38, %37 : vector<8x128xf32>
    %40 = arith.addf %29, %39 : vector<8x128xf32>
    %41 = vector.extract_strided_slice %6 {offsets = [0, 3], sizes = [8, 1], strides = [1, 1]} : vector<8x16xf32> to vector<8x1xf32>
    %c0_12 = arith.constant 0 : index
    %c3 = arith.constant 3 : index
    %c0_13 = arith.constant 0 : index
    %42 = vector.load %arg4[%c0_12, %c3, %c0_13] : memref<1x16x128xf32, #tpu.memory_space<vmem>>, vector<1x1x128xf32>
    %43 = vector.shape_cast %42 : vector<1x1x128xf32> to vector<1x128xf32>
    %44 = vector.broadcast %41 : vector<8x1xf32> to vector<8x128xf32>
    %45 = vector.broadcast %43 : vector<1x128xf32> to vector<8x128xf32>
    %46 = arith.addf %44, %45 : vector<8x128xf32>
    %c3_14 = arith.constant 3 : index
    %47 = memref.load %arg5[%c3_14] : memref<16xf32, #tpu.memory_space<smem>>
    %48 = math.tanh %46 : vector<8x128xf32>
    %49 = vector.broadcast %47 : f32 to vector<8x128xf32>
    %50 = arith.mulf %49, %48 : vector<8x128xf32>
    %51 = arith.addf %40, %50 : vector<8x128xf32>
    %52 = vector.extract_strided_slice %6 {offsets = [0, 4], sizes = [8, 1], strides = [1, 1]} : vector<8x16xf32> to vector<8x1xf32>
    %c0_15 = arith.constant 0 : index
    %c4 = arith.constant 4 : index
    %c0_16 = arith.constant 0 : index
    %53 = vector.load %arg4[%c0_15, %c4, %c0_16] : memref<1x16x128xf32, #tpu.memory_space<vmem>>, vector<1x1x128xf32>
    %54 = vector.shape_cast %53 : vector<1x1x128xf32> to vector<1x128xf32>
    %55 = vector.broadcast %52 : vector<8x1xf32> to vector<8x128xf32>
    %56 = vector.broadcast %54 : vector<1x128xf32> to vector<8x128xf32>
    %57 = arith.addf %55, %56 : vector<8x128xf32>
    %c4_17 = arith.constant 4 : index
    %58 = memref.load %arg5[%c4_17] : memref<16xf32, #tpu.memory_space<smem>>
    %59 = math.tanh %57 : vector<8x128xf32>
    %60 = vector.broadcast %58 : f32 to vector<8x128xf32>
    %61 = arith.mulf %60, %59 : vector<8x128xf32>
    %62 = arith.addf %51, %61 : vector<8x128xf32>
    %63 = vector.extract_strided_slice %6 {offsets = [0, 5], sizes = [8, 1], strides = [1, 1]} : vector<8x16xf32> to vector<8x1xf32>
    %c0_18 = arith.constant 0 : index
    %c5 = arith.constant 5 : index
    %c0_19 = arith.constant 0 : index
    %64 = vector.load %arg4[%c0_18, %c5, %c0_19] : memref<1x16x128xf32, #tpu.memory_space<vmem>>, vector<1x1x128xf32>
    %65 = vector.shape_cast %64 : vector<1x1x128xf32> to vector<1x128xf32>
    %66 = vector.broadcast %63 : vector<8x1xf32> to vector<8x128xf32>
    %67 = vector.broadcast %65 : vector<1x128xf32> to vector<8x128xf32>
    %68 = arith.addf %66, %67 : vector<8x128xf32>
    %c5_20 = arith.constant 5 : index
    %69 = memref.load %arg5[%c5_20] : memref<16xf32, #tpu.memory_space<smem>>
    %70 = math.tanh %68 : vector<8x128xf32>
    %71 = vector.broadcast %69 : f32 to vector<8x128xf32>
    %72 = arith.mulf %71, %70 : vector<8x128xf32>
    %73 = arith.addf %62, %72 : vector<8x128xf32>
    %74 = vector.extract_strided_slice %6 {offsets = [0, 6], sizes = [8, 1], strides = [1, 1]} : vector<8x16xf32> to vector<8x1xf32>
    %c0_21 = arith.constant 0 : index
    %c6 = arith.constant 6 : index
    %c0_22 = arith.constant 0 : index
    %75 = vector.load %arg4[%c0_21, %c6, %c0_22] : memref<1x16x128xf32, #tpu.memory_space<vmem>>, vector<1x1x128xf32>
    %76 = vector.shape_cast %75 : vector<1x1x128xf32> to vector<1x128xf32>
    %77 = vector.broadcast %74 : vector<8x1xf32> to vector<8x128xf32>
    %78 = vector.broadcast %76 : vector<1x128xf32> to vector<8x128xf32>
    %79 = arith.addf %77, %78 : vector<8x128xf32>
    %c6_23 = arith.constant 6 : index
    %80 = memref.load %arg5[%c6_23] : memref<16xf32, #tpu.memory_space<smem>>
    %81 = math.tanh %79 : vector<8x128xf32>
    %82 = vector.broadcast %80 : f32 to vector<8x128xf32>
    %83 = arith.mulf %82, %81 : vector<8x128xf32>
    %84 = arith.addf %73, %83 : vector<8x128xf32>
    %85 = vector.extract_strided_slice %6 {offsets = [0, 7], sizes = [8, 1], strides = [1, 1]} : vector<8x16xf32> to vector<8x1xf32>
    %c0_24 = arith.constant 0 : index
    %c7 = arith.constant 7 : index
    %c0_25 = arith.constant 0 : index
    %86 = vector.load %arg4[%c0_24, %c7, %c0_25] : memref<1x16x128xf32, #tpu.memory_space<vmem>>, vector<1x1x128xf32>
    %87 = vector.shape_cast %86 : vector<1x1x128xf32> to vector<1x128xf32>
    %88 = vector.broadcast %85 : vector<8x1xf32> to vector<8x128xf32>
    %89 = vector.broadcast %87 : vector<1x128xf32> to vector<8x128xf32>
    %90 = arith.addf %88, %89 : vector<8x128xf32>
    %c7_26 = arith.constant 7 : index
    %91 = memref.load %arg5[%c7_26] : memref<16xf32, #tpu.memory_space<smem>>
    %92 = math.tanh %90 : vector<8x128xf32>
    %93 = vector.broadcast %91 : f32 to vector<8x128xf32>
    %94 = arith.mulf %93, %92 : vector<8x128xf32>
    %95 = arith.addf %84, %94 : vector<8x128xf32>
    %96 = vector.extract_strided_slice %6 {offsets = [0, 8], sizes = [8, 1], strides = [1, 1]} : vector<8x16xf32> to vector<8x1xf32>
    %c0_27 = arith.constant 0 : index
    %c8 = arith.constant 8 : index
    %c0_28 = arith.constant 0 : index
    %97 = vector.load %arg4[%c0_27, %c8, %c0_28] : memref<1x16x128xf32, #tpu.memory_space<vmem>>, vector<1x1x128xf32>
    %98 = vector.shape_cast %97 : vector<1x1x128xf32> to vector<1x128xf32>
    %99 = vector.broadcast %96 : vector<8x1xf32> to vector<8x128xf32>
    %100 = vector.broadcast %98 : vector<1x128xf32> to vector<8x128xf32>
    %101 = arith.addf %99, %100 : vector<8x128xf32>
    %c8_29 = arith.constant 8 : index
    %102 = memref.load %arg5[%c8_29] : memref<16xf32, #tpu.memory_space<smem>>
    %103 = math.tanh %101 : vector<8x128xf32>
    %104 = vector.broadcast %102 : f32 to vector<8x128xf32>
    %105 = arith.mulf %104, %103 : vector<8x128xf32>
    %106 = arith.addf %95, %105 : vector<8x128xf32>
    %107 = vector.extract_strided_slice %6 {offsets = [0, 9], sizes = [8, 1], strides = [1, 1]} : vector<8x16xf32> to vector<8x1xf32>
    %c0_30 = arith.constant 0 : index
    %c9 = arith.constant 9 : index
    %c0_31 = arith.constant 0 : index
    %108 = vector.load %arg4[%c0_30, %c9, %c0_31] : memref<1x16x128xf32, #tpu.memory_space<vmem>>, vector<1x1x128xf32>
    %109 = vector.shape_cast %108 : vector<1x1x128xf32> to vector<1x128xf32>
    %110 = vector.broadcast %107 : vector<8x1xf32> to vector<8x128xf32>
    %111 = vector.broadcast %109 : vector<1x128xf32> to vector<8x128xf32>
    %112 = arith.addf %110, %111 : vector<8x128xf32>
    %c9_32 = arith.constant 9 : index
    %113 = memref.load %arg5[%c9_32] : memref<16xf32, #tpu.memory_space<smem>>
    %114 = math.tanh %112 : vector<8x128xf32>
    %115 = vector.broadcast %113 : f32 to vector<8x128xf32>
    %116 = arith.mulf %115, %114 : vector<8x128xf32>
    %117 = arith.addf %106, %116 : vector<8x128xf32>
    %118 = vector.extract_strided_slice %6 {offsets = [0, 10], sizes = [8, 1], strides = [1, 1]} : vector<8x16xf32> to vector<8x1xf32>
    %c0_33 = arith.constant 0 : index
    %c10 = arith.constant 10 : index
    %c0_34 = arith.constant 0 : index
    %119 = vector.load %arg4[%c0_33, %c10, %c0_34] : memref<1x16x128xf32, #tpu.memory_space<vmem>>, vector<1x1x128xf32>
    %120 = vector.shape_cast %119 : vector<1x1x128xf32> to vector<1x128xf32>
    %121 = vector.broadcast %118 : vector<8x1xf32> to vector<8x128xf32>
    %122 = vector.broadcast %120 : vector<1x128xf32> to vector<8x128xf32>
    %123 = arith.addf %121, %122 : vector<8x128xf32>
    %c10_35 = arith.constant 10 : index
    %124 = memref.load %arg5[%c10_35] : memref<16xf32, #tpu.memory_space<smem>>
    %125 = math.tanh %123 : vector<8x128xf32>
    %126 = vector.broadcast %124 : f32 to vector<8x128xf32>
    %127 = arith.mulf %126, %125 : vector<8x128xf32>
    %128 = arith.addf %117, %127 : vector<8x128xf32>
    %129 = vector.extract_strided_slice %6 {offsets = [0, 11], sizes = [8, 1], strides = [1, 1]} : vector<8x16xf32> to vector<8x1xf32>
    %c0_36 = arith.constant 0 : index
    %c11 = arith.constant 11 : index
    %c0_37 = arith.constant 0 : index
    %130 = vector.load %arg4[%c0_36, %c11, %c0_37] : memref<1x16x128xf32, #tpu.memory_space<vmem>>, vector<1x1x128xf32>
    %131 = vector.shape_cast %130 : vector<1x1x128xf32> to vector<1x128xf32>
    %132 = vector.broadcast %129 : vector<8x1xf32> to vector<8x128xf32>
    %133 = vector.broadcast %131 : vector<1x128xf32> to vector<8x128xf32>
    %134 = arith.addf %132, %133 : vector<8x128xf32>
    %c11_38 = arith.constant 11 : index
    %135 = memref.load %arg5[%c11_38] : memref<16xf32, #tpu.memory_space<smem>>
    %136 = math.tanh %134 : vector<8x128xf32>
    %137 = vector.broadcast %135 : f32 to vector<8x128xf32>
    %138 = arith.mulf %137, %136 : vector<8x128xf32>
    %139 = arith.addf %128, %138 : vector<8x128xf32>
    %140 = vector.extract_strided_slice %6 {offsets = [0, 12], sizes = [8, 1], strides = [1, 1]} : vector<8x16xf32> to vector<8x1xf32>
    %c0_39 = arith.constant 0 : index
    %c12 = arith.constant 12 : index
    %c0_40 = arith.constant 0 : index
    %141 = vector.load %arg4[%c0_39, %c12, %c0_40] : memref<1x16x128xf32, #tpu.memory_space<vmem>>, vector<1x1x128xf32>
    %142 = vector.shape_cast %141 : vector<1x1x128xf32> to vector<1x128xf32>
    %143 = vector.broadcast %140 : vector<8x1xf32> to vector<8x128xf32>
    %144 = vector.broadcast %142 : vector<1x128xf32> to vector<8x128xf32>
    %145 = arith.addf %143, %144 : vector<8x128xf32>
    %c12_41 = arith.constant 12 : index
    %146 = memref.load %arg5[%c12_41] : memref<16xf32, #tpu.memory_space<smem>>
    %147 = math.tanh %145 : vector<8x128xf32>
    %148 = vector.broadcast %146 : f32 to vector<8x128xf32>
    %149 = arith.mulf %148, %147 : vector<8x128xf32>
    %150 = arith.addf %139, %149 : vector<8x128xf32>
    %151 = vector.extract_strided_slice %6 {offsets = [0, 13], sizes = [8, 1], strides = [1, 1]} : vector<8x16xf32> to vector<8x1xf32>
    %c0_42 = arith.constant 0 : index
    %c13 = arith.constant 13 : index
    %c0_43 = arith.constant 0 : index
    %152 = vector.load %arg4[%c0_42, %c13, %c0_43] : memref<1x16x128xf32, #tpu.memory_space<vmem>>, vector<1x1x128xf32>
    %153 = vector.shape_cast %152 : vector<1x1x128xf32> to vector<1x128xf32>
    %154 = vector.broadcast %151 : vector<8x1xf32> to vector<8x128xf32>
    %155 = vector.broadcast %153 : vector<1x128xf32> to vector<8x128xf32>
    %156 = arith.addf %154, %155 : vector<8x128xf32>
    %c13_44 = arith.constant 13 : index
    %157 = memref.load %arg5[%c13_44] : memref<16xf32, #tpu.memory_space<smem>>
    %158 = math.tanh %156 : vector<8x128xf32>
    %159 = vector.broadcast %157 : f32 to vector<8x128xf32>
    %160 = arith.mulf %159, %158 : vector<8x128xf32>
    %161 = arith.addf %150, %160 : vector<8x128xf32>
    %162 = vector.extract_strided_slice %6 {offsets = [0, 14], sizes = [8, 1], strides = [1, 1]} : vector<8x16xf32> to vector<8x1xf32>
    %c0_45 = arith.constant 0 : index
    %c14 = arith.constant 14 : index
    %c0_46 = arith.constant 0 : index
    %163 = vector.load %arg4[%c0_45, %c14, %c0_46] : memref<1x16x128xf32, #tpu.memory_space<vmem>>, vector<1x1x128xf32>
    %164 = vector.shape_cast %163 : vector<1x1x128xf32> to vector<1x128xf32>
    %165 = vector.broadcast %162 : vector<8x1xf32> to vector<8x128xf32>
    %166 = vector.broadcast %164 : vector<1x128xf32> to vector<8x128xf32>
    %167 = arith.addf %165, %166 : vector<8x128xf32>
    %c14_47 = arith.constant 14 : index
    %168 = memref.load %arg5[%c14_47] : memref<16xf32, #tpu.memory_space<smem>>
    %169 = math.tanh %167 : vector<8x128xf32>
    %170 = vector.broadcast %168 : f32 to vector<8x128xf32>
    %171 = arith.mulf %170, %169 : vector<8x128xf32>
    %172 = arith.addf %161, %171 : vector<8x128xf32>
    %173 = vector.extract_strided_slice %6 {offsets = [0, 15], sizes = [8, 1], strides = [1, 1]} : vector<8x16xf32> to vector<8x1xf32>
    %c0_48 = arith.constant 0 : index
    %c15 = arith.constant 15 : index
    %c0_49 = arith.constant 0 : index
    %174 = vector.load %arg4[%c0_48, %c15, %c0_49] : memref<1x16x128xf32, #tpu.memory_space<vmem>>, vector<1x1x128xf32>
    %175 = vector.shape_cast %174 : vector<1x1x128xf32> to vector<1x128xf32>
    %176 = vector.broadcast %173 : vector<8x1xf32> to vector<8x128xf32>
    %177 = vector.broadcast %175 : vector<1x128xf32> to vector<8x128xf32>
    %178 = arith.addf %176, %177 : vector<8x128xf32>
    %c15_50 = arith.constant 15 : index
    %179 = memref.load %arg5[%c15_50] : memref<16xf32, #tpu.memory_space<smem>>
    %180 = math.tanh %178 : vector<8x128xf32>
    %181 = vector.broadcast %179 : f32 to vector<8x128xf32>
    %182 = arith.mulf %181, %180 : vector<8x128xf32>
    %183 = arith.addf %172, %182 : vector<8x128xf32>
    %c0_51 = arith.constant 0 : index
    %184 = arith.index_cast %3 : i32 to index
    %c0_52 = arith.constant 0 : index
    %185 = vector.load %arg6[%c0_51, %184, %c0_52] : memref<1x8x128xf32, #tpu.memory_space<vmem>>, vector<1x8x128xf32>
    %186 = vector.shape_cast %185 : vector<1x8x128xf32> to vector<8x128xf32>
    %187 = vector.shape_cast %183 : vector<8x128xf32> to vector<1x8x128xf32>
    tpu.vector_store %arg6[%c0_51, %184, %c0_52], %187 {strides = array<i32>} : memref<1x8x128xf32, #tpu.memory_space<vmem>>, vector<1x8x128xf32>,
    %c1_i32_53 = arith.constant 1 : i32
    return
  }
  func.func @transform_0(%arg0: i32, %arg1: i32, %arg2: i32) -> (i32, i32, i32) {
    %c0_i32 = arith.constant 0 : i32
    %c0_i32_0 = arith.constant 0 : i32
    return %arg0, %arg1, %c0_i32 : i32, i32, i32
  }
  func.func @transform_1(%arg0: i32, %arg1: i32, %arg2: i32) -> (i32, i32, i32) {
    %c0_i32 = arith.constant 0 : i32
    %c0_i32_0 = arith.constant 0 : i32
    return %arg0, %c0_i32, %arg2 : i32, i32, i32
  }
  func.func @transform_2(%arg0: i32, %arg1: i32, %arg2: i32) -> i32 {
    %c0_i32 = arith.constant 0 : i32
    %c0_i32_0 = arith.constant 0 : i32
    return %c0_i32 : i32
  }
  func.func @transform_3(%arg0: i32, %arg1: i32, %arg2: i32) -> (i32, i32, i32) {
    %c0_i32 = arith.constant 0 : i32
    return %arg0, %arg1, %arg2 : i32, i32, i32
  }
}

</mosaic_0001>

<bundles_post_ra>
// kernel: coattention_pallas.1
= control target key start
LH: loop header
LB: loop body
LE: loop exit
PB: predicated region body
PF: predicated region fallthrough
CT: control target
= control target key end

     0   :  { %8 = vsyncpa [#allocation4], 0  ;;  %s1106_s0 = inlined_call_operand.vmem [shape: f32[2,8,16], index: 0, kind: input, shape index: {}]   ;;  %s1107_s1 = inlined_call_operand.vmem [shape: f32[2,16,128], index: 1, kind: input, shape index: {}]   ;;  %s1108_s2 = inlined_call_operand.vmem [shape: f32[16], index: 2, kind: input, shape index: {}]   ;;  %s1109_s3 = inlined_call_operand.hbm [shape: f32[2,8,128], index: 3, kind: output, shape index: {}]  }
   0x1   :  { %9 = vsyncpa [#allocation3], 0 }
   0x2   :  { %11 = vsyncpa [#allocation3 + $0x1], 0  ;;  %s924_s12 = smov 0   ;;  %s926_s13 = smov 0  }
   0x3   :  { %s928_s14 = smov 0   ;;  %s930_s15 = smov 0  }
   0x4   :  { %s932_s16 = smov 0   ;;  %s934_s17 = smov 0  }
   0x5 LB: > { %s609_s18 = sadd.s32 4294967295, %s884_s17   ;;  %s610_s19 = sadd.s32 4294967294, %s884_s17   ;;  %s884_s17 = sphi %s934_s17, %s17_s17   ;;  %s880_s16 = sphi %s932_s16, %s1118_s16   ;;  %s876_s15 = sphi %s930_s15, %s1117_s15   ;;  %s872_s14 = sphi %s928_s14, %s1116_s14   ;;  %s868_s13 = sphi %s926_s13, %s1115_s13   ;;  %s864_s12 = sphi %s924_s12, %s1114_s12  }
   0x6   : > { %s36_s20 = sadd.s32 1, %s880_s16  ;;  %s124_s21 = sadd.s32 1, %s872_s14 }
   0x7   : > { %p38_p0 = scmp.ge.s32.totalorder %s36_s20, 2  ;;  %p134_p1 = scmp.ne.s32.totalorder %s872_s14, %s868_s13 }
   0x8   : > { %p135_p2 = scmp.eq.s32.totalorder %s609_s18, 1  ;;  %p140_p3 = scmp.ne.s32.totalorder %s868_s13, %s864_s12 }
   0x9   : > { %s1120_s20 = smov (%p38_p0, %s36_s20), 0  ;;  %p141_p5 = scmp.eq.s32.totalorder %s610_s19, 1 }
   0xa   : > { %p964_p4 = por %p135_p2, %p134_p1  ;;  %s117_s23 = ssub.s32 %s880_s16, %s1120_s20 }
   0xb   : > { %p611_p6 = scmp.ge.s32.totalorder %s884_s17, 1  ;;  %p122_p7 = scmp.eq.s32.totalorder %s117_s23, 0 }
   0xc   : > { %p971_p8 = por %p141_p5, %p140_p3  ;;  %p148_p9 = scmp.lt.s32.totalorder %s884_s17, 3 }
   0xd   : > { %s977_s25 = scalar_select %p122_p7, %s872_s14, %s124_s21  }
   0xe   : > { %p979_p10 = pnand %p611_p6, %p148_p9  ;;  %p983_p11 = scmp.eq.s32.totalorder %s609_s18, 0 }
   0xf   : > { %s161_s30 = sshll.u32 %s1108_s2, 4  ;;  %s162_s30 = int_to_ptr.vmem [resolvable:$true] %s161_s30 }
  0x10   : > { %p662_p12 = pneg %p979_p10  ;;  %s787_s4 = scalar_lea.vmem %s162_s30, 16 }
  0x11   : > { %p788_p0 = scmp.ne.s32.totalorder %s162_s30, %s787_s4  ;;  %p795_p5 = scmp.lt.s32.totalorder %s162_s30, %s162_s30 }
  0x12   : > { %p663_p13 = pnand %p983_p11, %p662_p12  ;;  %p796_p6 = scmp.lt.s32.totalorder %s787_s4, %s787_s4 }
  0x14   : > { %p789_p1 = pneg %p663_p13  ;;  %p797_p7 = por %p796_p6, %p795_p5 }
  0x16   : > { %p790_p2 = pnand %p789_p1, %p788_p0 }
  0x18   : > { %p791_p3 = pneg %p790_p2 }
  0x1a   : > { %p798_p9 = pnand %p797_p7, %p791_p3 }
  0x1c   : > { %801 = shalt.err (!%p798_p9)
}
  0x1d   : > { %s886_s5 = smov [#allocation2]   ;;  %195 = sbr.rel (%p979_p10) target bundleno = 250 (0xfa), region = 32 }
  0x1e   : > { %665 = dma.vmem_to_smem (!%p663_p13), %s162_s30, 16, %s886_s5, [#allocation4]  }
  0x24   : > { %855 = dma.done.wait (%p983_p11), [#allocation4], 16  }
  0x25   : > { %857 = vsyncadd (%p983_p11), [#allocation4], 4294967280 }
  0x26   : > { %201 = sfence }
  0x27   : > { %p230_p12 = scmp.lt.s32.totalorder %s876_s15, 1  ;;  %v887_v0 = vmov 2   ;;  %v888_v1 = vmov 0   ;;  %v889_v3 = vmov 3   ;;  %v890_v4 = vmov 1   ;;  %s257_s23 = sld [smem:[#allocation2]] }
  0x28   : > { %740 = vset.pattern.permute.xlu1 %v887_v0  ;;  %738 = vset.pattern.permute.xlu0 %v888_v1  ;;  %v891_v5 = vmov 4   ;;  %v892_v6 = vmov 5   ;;  %v893_v7 = vmov 6   ;;  %v894_v8 = vmov 8   ;;  %s622_s26 = sld [smem:[#allocation2 + $0x1]]  ;;  %s1020_s27 = sld [smem:[#allocation2 + $0x2]] }
  0x29   : > { %s1002_s6 = scalar_select %p230_p12, %s876_s15, 1  ;;  %v895_v9 = vmov 7   ;;  %v896_v10 = vmov 11   ;;  %v897_v11 = vmov 9   ;;  %v898_v12 = vmov 14  }
  0x2a   : > { %v899_v13 = vmov 10   ;;  %v900_v14 = vmov 15   ;;  %v901_v15 = vmov 12   ;;  %v902_v16 = vmov 13   ;;  %s1022_s28 = sld [smem:[#allocation2 + $0x3]]  ;;  %s1024_s29 = sld [smem:[#allocation2 + $0x4]] }
  0x2b   : > { %s617_s7 = sshll.u32 %s1002_s6, 3  ;;  %s655_s11 = sshll.u32 %s1002_s6, 4 }
  0x2c   : > { %s236_s10 = scalar_lea.vmem %s1106_s0, %s617_s7  ;;  %s1012_s21 = scalar_lea.vmem %s1107_s1, %s655_s11 }
  0x2d   : > { %v245_v2 = vld [vmem:[%s236_s10] sm:$0xff]  ;;  %v259_v37 = vstv %s257_s23  ;;  %s1027_s30 = sld [smem:[#allocation2 + $0x5]]  ;;  %v635_v39 = vld [vmem:[%s1012_s21 + $0x8] ss:$0 sm:$0xff]  ;;  %s1032_s4 = sld [smem:[#allocation2 + $0x6]] }
  0x2e   : > { %279 = vperm.xlu1 %740, %v245_v2   ;;  %249 = vperm.xlu0 %738, %v245_v2   ;;  %v620_v17 = vld [vmem:[%s1012_s21] ss:$0 sm:$0xff]  ;;  %v623_v20 = vld [vmem:[%s1012_s21 + $0x2] ss:$0 sm:$0xff]  ;;  %v621_v22 = vld [vmem:[%s1012_s21 + $0x1] ss:$0 sm:$0xff]  ;;  %v274_v42 = vstv %s622_s26 }
  0x2f   : > { %v625_v24 = vld [vmem:[%s1012_s21 + $0x3] ss:$0 sm:$0xff]  ;;  %v627_v29 = vld [vmem:[%s1012_s21 + $0x4] ss:$0 sm:$0xff]  ;;  %v629_v30 = vld [vmem:[%s1012_s21 + $0x5] ss:$0 sm:$0xff]  ;;  %v289_v48 = vstv %s1020_s27 }
  0x30   : > { %v631_v35 = vld [vmem:[%s1012_s21 + $0x6] ss:$0 sm:$0xff]  ;;  %v633_v45 = vld [vmem:[%s1012_s21 + $0x7] ss:$0 sm:$0xff]  ;;  %v304_v52 = vstv %s1022_s28  ;;  %v319_v53 = vstv %s1024_s29  ;;  %s1037_s5 = sld [smem:[#allocation2 + $0x7]]  ;;  %s1040_s6 = sld [smem:[#allocation2 + $0x8]] }
  0x31   : > { %v637_v59 = vld [vmem:[%s1012_s21 + $0x9] ss:$0 sm:$0xff]  ;;  %v641_v1 = vld [vmem:[%s1012_s21 + $0xb] ss:$0 sm:$0xff]  ;;  %s638_s7 = sld [smem:[#allocation2 + $0x9]]  ;;  %s1047_s8 = sld [smem:[#allocation2 + $0xa]] }
  0x32   : > { %741 = vset.pattern.permute.xlu1 %v889_v3  ;;  %739 = vset.pattern.permute.xlu0 %v890_v4  ;;  %s642_s9 = sld [smem:[#allocation2 + $0xb]]  ;;  %s644_s10 = sld [smem:[#allocation2 + $0xc]] }
  0x33   : > { %294 = vperm.xlu1 %741, %v245_v2   ;;  %264 = vperm.xlu0 %739, %v245_v2   ;;  %v334_v58 = vstv %s1027_s30  ;;  %s646_s11 = sld [smem:[#allocation2 + $0xd]]  ;;  %s648_s18 = sld [smem:[#allocation2 + $0xe]] }
  0x34   : > { %s650_s19 = sld [smem:[#allocation2 + $0xf]]  ;;  %s227_s23 = sand.u32 1, %s868_s13  }
  0x35   : > { %s652_s26 = sshll.u32 %s876_s15, 7  ;;  %s903_s15 = smov [#allocation5]  }
  0x37   : > { %742 = vset.pattern.permute.xlu1 %v891_v5  ;;  %743 = vset.pattern.permute.xlu0 %v892_v6  ;;  %v349_v6 = vstv %s1032_s4  ;;  %s1059_s4 = scalar_lea.hbm %s1109_s3, %s652_s26 }
  0x38   : > { %309 = vperm.xlu1 %742, %v245_v2   ;;  %324 = vperm.xlu0 %743, %v245_v2  }
  0x3c   : > { %744 = vset.pattern.permute.xlu1 %v893_v7  ;;  %746 = vset.pattern.permute.xlu0 %v894_v8 }
  0x3d   : > { %339 = vperm.xlu1 %744, %v245_v2   ;;  %369 = vperm.xlu0 %746, %v245_v2  }
  0x41   : > { %745 = vset.pattern.permute.xlu1 %v895_v9  ;;  %749 = vset.pattern.permute.xlu0 %v896_v10  ;;  %v639_v9 = vld [vmem:[%s1012_s21 + $0xa] ss:$0 sm:$0xff] }
  0x42   : > { %354 = vperm.xlu1 %745, %v245_v2   ;;  %414 = vperm.xlu0 %749, %v245_v2  }
  0x46   : > { %747 = vset.pattern.permute.xlu1 %v897_v11  ;;  %752 = vset.pattern.permute.xlu0 %v898_v12 }
  0x47   : > { %384 = vperm.xlu1 %747, %v245_v2   ;;  %459 = vperm.xlu0 %752, %v245_v2  }
  0x4b   : > { %748 = vset.pattern.permute.xlu1 %v899_v13  ;;  %754 = vset.pattern.permute.xlu0 %v900_v14 }
  0x4c   : > { %399 = vperm.xlu1 %748, %v245_v2  }
  0x50   : > { %750 = vset.pattern.permute.xlu1 %v901_v15 }
  0x51   : > { %429 = vperm.xlu1 %750, %v245_v2  }
  0x55   : > { %751 = vset.pattern.permute.xlu1 %v902_v16 }
  0x56   : > { %444 = vperm.xlu1 %751, %v245_v2  }
  0x5a   : > { %753 = vset.pattern.permute.xlu1 %v900_v14  ;;  %v364_v14 = vstv %s1037_s5  ;;  %s489_s5 = scalar_lea.sflag [#allocation3], %s227_s23 }
  0x5b   : > { %474 = vperm.xlu1 %753, %v245_v2  }
  0xad   : > { %v280_v18 = vpop.permute.xlu1 %279  ;;  %v250_v19 = vpop.permute.xlu0 %249 }
  0xae   : > { %v256_v21 = vadd.f32 %v620_v17, %v250_v19  ;;  %v286_v23 = vadd.f32 %v623_v20, %v280_v18  ;;  %v379_v18 = vstv %s1040_s6  ;;  %v643_v19 = vld [vmem:[%s1012_s21 + $0xc] ss:$0 sm:$0xff] }
  0xb0   : > { %755 = vtanh.f32 %v256_v21 }
  0xb1   : > { %757 = vtanh.f32 %v286_v23 }
  0xb2   : > { %v295_v25 = vpop.permute.xlu1 %294  ;;  %v265_v26 = vpop.permute.xlu0 %264 }
  0xb3   : > { %v271_v27 = vadd.f32 %v621_v22, %v265_v26  ;;  %v301_v28 = vadd.f32 %v625_v24, %v295_v25  ;;  %v647_v22 = vld [vmem:[%s1012_s21 + $0xe] ss:$0 sm:$0xff] }
  0xb5   : > { %759 = vtanh.f32 %v271_v27 }
  0xb6   : > { %761 = vtanh.f32 %v301_v28  ;;  %v394_v28 = vstv %s638_s7  ;;  %s806_s7 = sshll.u32 %s903_s15, 4  ;;  %s807_s7 = int_to_ptr.vmem [resolvable:$false] %s806_s7 }
  0xb7   : > { %v310_v31 = vpop.permute.xlu1 %309  ;;  %v325_v32 = vpop.permute.xlu0 %324 }
  0xb8   : > { %v316_v33 = vadd.f32 %v627_v29, %v310_v31  ;;  %v331_v34 = vadd.f32 %v629_v30, %v325_v32  ;;  %v645_v31 = vld [vmem:[%s1012_s21 + $0xd] ss:$0 sm:$0xff] }
  0xba   : > { %763 = vtanh.f32 %v316_v33  ;;  %v756_v36 = vpop.eup %755 }
  0xbb   : > { %765 = vtanh.f32 %v331_v34  ;;  %v758_v43 = vpop.eup %757  ;;  %v260_v44 = vmul.f32 %v756_v36, %v259_v37 }
  0xbc   : > { %v340_v38 = vpop.permute.xlu1 %339  ;;  %v370_v40 = vpop.permute.xlu0 %369  ;;  %v290_v55 = vmul.f32 %v758_v43, %v289_v48 }
  0xbd   : > { %v346_v41 = vadd.f32 %v631_v35, %v340_v38  ;;  %v376_v46 = vadd.f32 %v635_v39, %v370_v40  ;;  %v409_v35 = vstv %s1047_s8  ;;  %v424_v39 = vstv %s642_s9  ;;  %v649_v40 = vld [vmem:[%s1012_s21 + $0xf] ss:$0 sm:$0xff]  ;;  %s616_s21 = sshll.u32 %s227_s23, 3  ;;  %s808_s8 = scalar_lea.vmem %s807_s7, 256 }
  0xbe   : > { %s229_s27 = scalar_lea.vmem [#allocation5], %s616_s21 }
  0xbf   : > { %767 = vtanh.f32 %v346_v41  ;;  %v760_v47 = vpop.eup %759  ;;  %s504_s28 = sshll.u32 %s229_s27, 4  ;;  %s1061_s28 = int_to_ptr.vmem [resolvable:$true] %s504_s28 }
  0xc0   : > { %v275_v49 = vmul.f32 %v760_v47, %v274_v42  ;;  %v762_v51 = vpop.eup %761  ;;  %769 = vtanh.f32 %v376_v46  ;;  %v439_v47 = vstv %s644_s10  ;;  %s802_s6 = scalar_lea.vmem %s1061_s28, 128  ;;  %p809_p0 = scmp.lt.s32.totalorder %s1061_s28, %s807_s7 }
  0xc1   : > { %v355_v50 = vpop.permute.xlu1 %354  ;;  %v305_v61 = vmul.f32 %v762_v51, %v304_v52  ;;  %v415_v2 = vpop.permute.xlu0 %414  ;;  %v454_v52 = vstv %s646_s11  ;;  %p803_p10 = scmp.ne.s32.totalorder %s1061_s28, %s802_s6  ;;  %p810_p1 = scmp.lt.s32.totalorder %s808_s8, %s802_s6 }
  0xc2   : > { %v361_v54 = vadd.f32 %v633_v45, %v355_v50  ;;  %v276_v56 = vadd.f32 %v275_v49, %v260_v44  ;;  %v421_v10 = vadd.f32 %v641_v1, %v415_v2 }
  0xc3   : > { %p804_p11 = pnand %p803_p10, %p964_p4  ;;  %p811_p2 = por %p810_p1, %p809_p0 }
  0xc4   : > { %v764_v57 = vpop.eup %763  ;;  %771 = vtanh.f32 %v361_v54  ;;  %v291_v62 = vadd.f32 %v290_v55, %v276_v56 }
  0xc5   : > { %v766_v60 = vpop.eup %765  ;;  %v320_v63 = vmul.f32 %v764_v57, %v319_v53  ;;  %v469_v53 = vstv %s648_s18  ;;  %p805_p13 = pneg %p804_p11 }
  0xc6   : > { %v385_v0 = vpop.permute.xlu1 %384  ;;  %v306_v3 = vadd.f32 %v305_v61, %v291_v62  ;;  %v335_v4 = vmul.f32 %v766_v60, %v334_v58  ;;  %v460_v23 = vpop.permute.xlu0 %459 }
  0xc7   : > { %v391_v5 = vadd.f32 %v637_v59, %v385_v0  ;;  %v466_v29 = vadd.f32 %v647_v22, %v460_v23  ;;  %v484_v59 = vstv %s650_s19  ;;  %p812_p3 = pnand %p811_p2, %p805_p13 }
  0xc8   : > { %v321_v8 = vadd.f32 %v320_v63, %v306_v3 }
  0xc9   : > { %v768_v7 = vpop.eup %767  ;;  %773 = vtanh.f32 %v391_v5 }
  0xca   : > { %v336_v11 = vadd.f32 %v335_v4, %v321_v8  ;;  %v350_v12 = vmul.f32 %v768_v7, %v349_v6  ;;  %v770_v16 = vpop.eup %769  ;;  %775 = vtanh.f32 %v421_v10 }
  0xcb   : > { %v400_v13 = vpop.permute.xlu1 %399  ;;  %v380_v26 = vmul.f32 %v770_v16, %v379_v18 }
  0xcc   : > { %v406_v15 = vadd.f32 %v639_v9, %v400_v13  ;;  %v351_v20 = vadd.f32 %v350_v12, %v336_v11 }
  0xce   : > { %v772_v17 = vpop.eup %771  ;;  %777 = vtanh.f32 %v406_v15 }
  0xcf   : > { %v365_v21 = vmul.f32 %v772_v17, %v364_v14 }
  0xd0   : > { %v430_v24 = vpop.permute.xlu1 %429 }
  0xd1   : > { %v366_v25 = vadd.f32 %v365_v21, %v351_v20  ;;  %v436_v27 = vadd.f32 %v643_v19, %v430_v24 }
  0xd3   : > { %v774_v30 = vpop.eup %773  ;;  %779 = vtanh.f32 %v436_v27  ;;  %v381_v32 = vadd.f32 %v380_v26, %v366_v25 }
  0xd4   : > { %v395_v33 = vmul.f32 %v774_v30, %v394_v28  ;;  %781 = vtanh.f32 %v466_v29  ;;  %v776_v37 = vpop.eup %775 }
  0xd5   : > { %v445_v34 = vpop.permute.xlu1 %444  ;;  %v425_v45 = vmul.f32 %v776_v37, %v424_v39 }
  0xd6   : > { %v451_v36 = vadd.f32 %v645_v31, %v445_v34  ;;  %v396_v41 = vadd.f32 %v395_v33, %v381_v32 }
  0xd8   : > { %v778_v38 = vpop.eup %777  ;;  %783 = vtanh.f32 %v451_v36 }
  0xd9   : > { %v410_v42 = vmul.f32 %v778_v38, %v409_v35 }
  0xda   : > { %v475_v43 = vpop.permute.xlu1 %474 }
  0xdb   : > { %v411_v44 = vadd.f32 %v410_v42, %v396_v41  ;;  %v481_v46 = vadd.f32 %v649_v40, %v475_v43 }
  0xdd   : > { %v780_v48 = vpop.eup %779  ;;  %785 = vtanh.f32 %v481_v46  ;;  %v426_v50 = vadd.f32 %v425_v45, %v411_v44 }
  0xde   : > { %v440_v49 = vmul.f32 %v780_v48, %v439_v47  ;;  %v782_v51 = vpop.eup %781 }
  0xdf   : > { %v470_v57 = vmul.f32 %v782_v51, %v469_v53 }
  0xe0   : > { %v441_v55 = vadd.f32 %v440_v49, %v426_v50 }
  0xe2   : > { %v784_v54 = vpop.eup %783 }
  0xe3   : > { %v455_v56 = vmul.f32 %v784_v54, %v454_v52 }
  0xe5   : > { %v456_v58 = vadd.f32 %v455_v56, %v441_v55 }
  0xe7   : > { %v786_v60 = vpop.eup %785  ;;  %v471_v61 = vadd.f32 %v470_v57, %v456_v58 }
  0xe8   : > { %v485_v62 = vmul.f32 %v786_v60, %v484_v59 }
  0xea   : > { %v486_v63 = vadd.f32 %v485_v62, %v471_v61 }
  0xec   : > { %487 = vst [vmem:[%s229_s27] sm:$0xff] %v486_v63 }
  0xed   : > { %815 = shalt.err (!%p812_p3)
}
  0xee   : > { %s816_s9 = scalar_lea.hbm %s1059_s4, 128  ;;  %s820_s18 = scalar_lea.hbm %s1109_s3, 256 }
  0xef   : > { %p817_p5 = scmp.ne.s32.totalorder %s1059_s4, %s816_s9  ;;  %p821_p9 = scmp.lt.u32.totalorder %s1059_s4, %s1109_s3 }
  0xf0   : > { %p822_p12 = scmp.lt.u32.totalorder %s820_s18, %s816_s9  ;;  %p824_p11 = scmp.lt.u32.totalorder %s816_s9, %s1059_s4 }
  0xf1   : > { %p818_p6 = pnand %p817_p5, %p964_p4 }
  0xf2   : > { %p823_p10 = por %p822_p12, %p821_p9 }
  0xf3   : > { %p819_p7 = pneg %p818_p6 }
  0xf4   : > { %p825_p13 = por %p824_p11, %p823_p10 }
  0xf6   : > { %p826_p0 = pnand %p825_p13, %p819_p7 }
  0xf8   : > { %829 = shalt.err (!%p826_p0)
}
  0xf9   : > { %660 = dma.vmem_to_hbm [thread:$0]  (%p964_p4), %s1061_s28, 128, %s1059_s4, %s489_s5  }
  0xfa PF: > { %p672_p1 = scmp.ge.s32.totalorder %s884_s17, 2  ;;  %s516_s21 = sand.u32 1, %s864_s12  }
  0xfb   : > { %s517_s26 = scalar_lea.sflag [#allocation3], %s516_s21 }
  0xfc   : > { %p667_p2 = pnand %p672_p1, %p971_p8 }
  0xfe   : > { %859 = dma.done.wait (!%p667_p2), %s517_s26, 128  }
  0xff   : > { %861 = vsyncadd (!%p667_p2), %s517_s26, 4294967168  ;;  %s17_s17 = sadd.s32 1, %s884_s17   ;;  %s1114_s12 = smov %s868_s13 }
 0x100   : > { %p14_p3 = scmp.ge.s32.totalorder %s17_s17, 4   ;;  %s1115_s13 = smov %s872_s14 }
 0x101   : > { %s1116_s14 = smov %s977_s25  ;;  %s1117_s15 = smov %s880_s16 }
 0x102   : > { %s1118_s16 = smov %s1120_s20  ;;  %16 = sbr.rel (!%p14_p3) target bundleno = 5 (0x5), region = 75 }
 0x109   :  { %522 = vsyncpa [#allocation3], 1 }
 0x10a   :  { %524 = vsyncpa [#allocation3 + $0x1], 1 }
 0x10b   :  { %525 = vsyncpa [#allocation4], 1 }
 0x10c   :  { %527 = vsyncpa [#allocation4 + $0x1], 1 }

</bundles_post_ra>
